<compile_context>
chip_gen: v7x
topology: tpu7x:2x2x1
jax: 0.10.0
libtpu: 0.0.40
codegen_flags: <defaults>
</compile_context>

<pallas_src>
import math
from functools import partial

import jax
import jax.numpy as jnp
from jax.experimental import pallas as pl
from jax.experimental.pallas import tpu as pltpu


# ------------------------------ tile helper -------------------------------- #
def _pick_tile(dim, target, align):
    """Largest `align`-multiple <= target that divides dim, else the full dim."""
    dim = int(dim)
    if dim <= target:
        return dim
    t = (target // align) * align
    while t >= align:
        if dim % t == 0:
            return t
        t -= align
    return dim


# ----------------------------- Linear kernel ------------------------------- #
def _linear_kernel(x_ref, w_ref, b_ref, o_ref, acc_ref):
    # y = x @ W^T + b   (W^T passed in as w_ref); K is the last grid axis.
    @pl.when(pl.program_id(2) == 0)
    def _():
        acc_ref[...] = jnp.zeros_like(acc_ref)

    acc_ref[...] += jnp.dot(x_ref[...], w_ref[...],
                            preferred_element_type=jnp.float32)

    @pl.when(pl.program_id(2) == pl.num_programs(2) - 1)
    def _():
        o_ref[...] = (acc_ref[...] + b_ref[...].astype(jnp.float32)).astype(o_ref.dtype)


def linear(x, w_t, b, *, tm=256, tn=256, tk=512):
    """x: (M, K), w_t: (K, N), b: (N,) -> (M, N), tiled + pipelined."""
    M, K = x.shape
    N = w_t.shape[1]
    TM = _pick_tile(M, tm, 8)
    TN = _pick_tile(N, tn, 128)
    TK = _pick_tile(K, tk, 128)
    grid = (M // TM, N // TN, K // TK)
    itemsize = x.dtype.itemsize
    return pl.pallas_call(
        _linear_kernel,
        out_shape=jax.ShapeDtypeStruct((M, N), x.dtype),
        grid=grid,
        in_specs=[
            pl.BlockSpec((TM, TK), lambda i, j, k: (i, k)),
            pl.BlockSpec((TK, TN), lambda i, j, k: (k, j)),
            pl.BlockSpec((1, TN), lambda i, j, k: (0, j)),
        ],
        out_specs=pl.BlockSpec((TM, TN), lambda i, j, k: (i, j)),
        scratch_shapes=[pltpu.VMEM((TM, TN), jnp.float32)],
        compiler_params=pltpu.CompilerParams(
            dimension_semantics=("parallel", "parallel", "arbitrary")),
        cost_estimate=pl.CostEstimate(
            flops=2 * M * N * K,
            transcendentals=0,
            bytes_accessed=int((M * K + K * N + M * N + N) * itemsize)),
    )(x, w_t, b.reshape(1, N))


# --------------------------- Attention kernel ------------------------------ #
def _attn_kernel(*refs, scale, masked, n_heads):
    # Per (batch, L-tile) step: q (TL, H, E), k (S, H, E), v (S, H, Dv),
    # optional mask (TL, S); output (H, TL, Dv).
    if masked:
        q_ref, k_ref, v_ref, m_ref, o_ref = refs
    else:
        q_ref, k_ref, v_ref, o_ref = refs
        m_ref = None

    # Fold the softmax scale into q (cheaper than scaling (TL, S) scores per head).
    q = q_ref[...].astype(jnp.float32) * scale          # (TL, H, E)
    k = k_ref[...].astype(jnp.float32)                  # (S,  H, E)
    v = v_ref[...]                                      # (S,  H, Dv)
    m = m_ref[...].astype(jnp.float32) if masked else None

    # Static unroll over heads: 2-D MXU matmuls, no k.T relayout (contract dim 1/1).
    for h in range(n_heads):
        qh = q[:, h, :]                                 # (TL, E)
        kh = k[:, h, :]                                 # (S,  E)
        vh = v[:, h, :]                                 # (S,  Dv)
        s = jax.lax.dot_general(qh, kh, (((1,), (1,)), ((), ())),
                                preferred_element_type=jnp.float32)   # (TL, S)
        s_max = jnp.max(s, axis=-1, keepdims=True)
        e = jnp.exp(s - s_max)
        denom = jnp.sum(e, axis=-1, keepdims=True)
        r = pl.reciprocal(denom, approx=True)
        r = r * (2.0 - denom * r)                       # one Newton step -> ~f32 exact
        a = e * r
        if masked:
            a = a * m                                   # matches torch: A * mask (post-softmax)
        av = jnp.dot(a.astype(vh.dtype), vh,
                     preferred_element_type=jnp.float32)              # (TL, Dv)
        o_ref[h, :, :] = av.astype(o_ref.dtype)


def mask_attention(q_blhe, k_bshe, v_bshd, mask_ls, scale, *, tl=256):
    """q (B,L,H,E), k (B,S,H,E), v (B,S,H,Dv), mask (L,S)|None -> (B,H,L,Dv)."""
    B, L, H, E = q_blhe.shape
    S = k_bshe.shape[1]
    Dv = v_bshd.shape[3]
    TL = _pick_tile(L, tl, 8)
    nL = L // TL
    masked = mask_ls is not None

    in_specs = [
        pl.BlockSpec((None, TL, H, E), lambda b, l: (b, l, 0, 0)),
        pl.BlockSpec((None, S, H, E), lambda b, l: (b, 0, 0, 0)),
        pl.BlockSpec((None, S, H, Dv), lambda b, l: (b, 0, 0, 0)),
    ]
    args = [q_blhe, k_bshe, v_bshd]
    mask_bytes = 0
    if masked:
        in_specs.append(pl.BlockSpec((TL, S), lambda b, l: (l, 0)))
        args.append(mask_ls)
        mask_bytes = int(mask_ls.size * mask_ls.dtype.itemsize)

    itemsize = q_blhe.dtype.itemsize
    flops = 2 * B * H * L * S * (E + Dv)
    transcendentals = B * H * L * S + B * H * L           # exp + reciprocal
    bytes_accessed = int(itemsize * (q_blhe.size + k_bshe.size + v_bshd.size
                                     + B * H * L * Dv)) + mask_bytes

    return pl.pallas_call(
        partial(_attn_kernel, scale=scale, masked=masked, n_heads=H),
        out_shape=jax.ShapeDtypeStruct((B, H, L, Dv), q_blhe.dtype),
        grid=(B, nL),
        in_specs=in_specs,
        out_specs=pl.BlockSpec((None, H, TL, Dv), lambda b, l: (b, 0, l, 0)),
        compiler_params=pltpu.CompilerParams(
            dimension_semantics=("parallel", "parallel")),
        cost_estimate=pl.CostEstimate(flops=flops,
                                      transcendentals=transcendentals,
                                      bytes_accessed=bytes_accessed),
    )(*args)


# ------------------------------ Full layer --------------------------------- #
def mask_attention_layer(queries, keys, values, params, n_heads,
                         mask=None, mix=True):
    """
    queries: (B, L, d_model), keys: (B, S, d_model), values: (B, S, d_model)
    mask: (L, S) or None
    returns: (B, L, d_model)
    """
    B, L, d_model = queries.shape
    _, S, _ = keys.shape
    H = n_heads

    dq = params["wq_t"].shape[1]      # H * d_keys
    dk_w = params["wk_t"].shape[1]    # H * d_keys
    dv_w = params["wv_t"].shape[1]    # H * d_values
    E = dq // H
    Dv = dv_w // H

    if (queries is keys) and (keys is values) and ("wqkv_t" in params):
        # Self-attention: one fused wide matmul over x instead of three passes.
        x = queries.reshape(B * L, d_model)
        qkv = linear(x, params["wqkv_t"], params["bqkv"])
        q = qkv[:, :dq]
        k = qkv[:, dq:dq + dk_w]
        v = qkv[:, dq + dk_w:]
    elif (keys is values) and ("wkv_t" in params):
        # Shared KV source: fuse the K and V projections into one wide matmul.
        q = linear(queries.reshape(B * L, d_model), params["wq_t"], params["bq"])
        kv = linear(keys.reshape(B * S, d_model), params["wkv_t"], params["bkv"])
        k = kv[:, :dk_w]
        v = kv[:, dk_w:]
    else:
        q = linear(queries.reshape(B * L, d_model), params["wq_t"], params["bq"])
        k = linear(keys.reshape(B * S, d_model), params["wk_t"], params["bk"])
        v = linear(values.reshape(B * S, d_model), params["wv_t"], params["bv"])

    # Natural (B, L, H, E) layout — contiguous reshapes only, no XLA transposes.
    q4 = q.reshape(B, L, H, E)
    k4 = k.reshape(B, S, H, E)
    v4 = v.reshape(B, S, H, Dv)

    scale = 1.0 / math.sqrt(E)  # MaskAttention default scale
    out_bhld = mask_attention(q4, k4, v4, mask, scale)   # (B, H, L, Dv)

    if mix:
        # torch: (B,L,H,D) -> transpose(2,1) -> (B,H,L,D) contiguous -> view(B,L,-1)
        out2 = out_bhld.reshape(B, L, H * Dv)            # free contiguous reshape
    else:
        out2 = jnp.transpose(out_bhld, (0, 2, 1, 3)).reshape(B, L, H * Dv)

    y = linear(out2.reshape(B * L, H * Dv), params["wo_t"], params["bo"])
    return y.reshape(B, L, d_model)


# ------------------------- Deterministic params ---------------------------- #
def init_params(key, d_model, n_heads, dtype=jnp.float32):
    d_keys = d_model // n_heads
    d_values = d_model // n_heads

    def linear_init(k, fan_in, fan_out):
        k1, k2 = jax.random.split(k)
        bound = 1.0 / math.sqrt(fan_in)
        w = jax.random.uniform(k1, (fan_out, fan_in), dtype, -bound, bound)
        b = jax.random.uniform(k2, (fan_out,), dtype, -bound, bound)
        return w.T, b  # store transposed for x @ W^T

    ks = jax.random.split(key, 4)
    wq_t, bq = linear_init(ks[0], d_model, d_keys * n_heads)
    wk_t, bk = linear_init(ks[1], d_model, d_keys * n_heads)
    wv_t, bv = linear_init(ks[2], d_model, d_values * n_heads)
    wo_t, bo = linear_init(ks[3], d_values * n_heads, d_model)
    params = dict(wq_t=wq_t, bq=bq, wk_t=wk_t, bk=bk,
                  wv_t=wv_t, bv=bv, wo_t=wo_t, bo=bo)
    # Precomputed fused weights for self-attention / shared-KV paths.
    params["wqkv_t"] = jnp.concatenate([wq_t, wk_t, wv_t], axis=1)
    params["bqkv"] = jnp.concatenate([bq, bk, bv], axis=0)
    params["wkv_t"] = jnp.concatenate([wk_t, wv_t], axis=1)
    params["bkv"] = jnp.concatenate([bk, bv], axis=0)
    return params


# -------------------------- Pure-JAX reference ----------------------------- #
def _reference(queries, keys, values, params, n_heads, mask=None, mix=True):
    B, L, d_model = queries.shape
    _, S, _ = keys.shape
    H = n_heads
    q = (queries.reshape(B * L, d_model) @ params["wq_t"] + params["bq"]).reshape(B, L, H, -1)
    k = (keys.reshape(B * S, d_model) @ params["wk_t"] + params["bk"]).reshape(B, S, H, -1)
    v = (values.reshape(B * S, d_model) @ params["wv_t"] + params["bv"]).reshape(B, S, H, -1)
    E = q.shape[-1]
    scale = 1.0 / math.sqrt(E)
    scores = jnp.einsum("blhe,bshe->bhls", q, k)
    A = jax.nn.softmax(scale * scores, axis=-1)
    if mask is not None:
        A = A * mask
    out = jnp.einsum("bhls,bshd->blhd", A, v)  # (B, L, H, D)
    if mix:
        out = jnp.transpose(out, (0, 2, 1, 3))  # (B, H, L, D)
    out = out.reshape(B, L, -1)
    return (out.reshape(B * L, -1) @ params["wo_t"] + params["bo"]).reshape(B, L, d_model)


# --------------------------------- Main ------------------------------------ #
if __name__ == "__main__":
    B, L, S, d_model, n_heads = 2, 8, 8, 32, 4

    key = jax.random.PRNGKey(0)
    kq, kk, kv, kp, km = jax.random.split(key, 5)
    queries = jax.random.normal(kq, (B, L, d_model), jnp.float32)
    keys = jax.random.normal(kk, (B, S, d_model), jnp.float32)
    values = jax.random.normal(kv, (B, S, d_model), jnp.float32)
    mask = (jax.random.uniform(km, (L, S)) > 0.3).astype(jnp.float32)
    params = init_params(kp, d_model, n_heads)

    # 1) cross-attention, no mask, mix=True
    out = mask_attention_layer(queries, keys, values, params, n_heads,
                               mask=None, mix=True)
    out = jax.block_until_ready(out)
    ref = _reference(queries, keys, values, params, n_heads, mask=None, mix=True)
    assert out.shape == (B, L, d_model)
    assert jnp.allclose(out, ref, atol=1e-3, rtol=1e-3)

    # 2) self-attention (fused QKV projection path), no mask
    out_sa = mask_attention_layer(queries, queries, queries, params, n_heads,
                                  mask=None, mix=True)
    out_sa = jax.block_until_ready(out_sa)
    ref_sa = _reference(queries, queries, queries, params, n_heads,
                        mask=None, mix=True)
    assert jnp.allclose(out_sa, ref_sa, atol=1e-3, rtol=1e-3)

    # 3) cross-attention with mask, mix=False
    out_m = mask_attention_layer(queries, keys, values, params, n_heads,
                                 mask=mask, mix=False)
    out_m = jax.block_until_ready(out_m)
    ref_m = _reference(queries, keys, values, params, n_heads,
                       mask=mask, mix=False)
    assert jnp.allclose(out_m, ref_m, atol=1e-3, rtol=1e-3)

    # 4) cross-attention with shared KV source (fused KV projection path), mask, mix=True
    out_kv = mask_attention_layer(queries, keys, keys, params, n_heads,
                                  mask=mask, mix=True)
    out_kv = jax.block_until_ready(out_kv)
    ref_kv = _reference(queries, keys, keys, params, n_heads,
                        mask=mask, mix=True)
    assert jnp.allclose(out_kv, ref_kv, atol=1e-3, rtol=1e-3)

    print("KERNEL_OK")
</pallas_src>

<mosaic_0001>
module attributes {stable_mosaic.version = 11 : i64} {
  func.func @_linear_kernel(%arg0: i32, %arg1: i32, %arg2: i32, %arg3: memref<16x32xf32, #tpu.memory_space<vmem>>, %arg4: memref<32x32xf32, #tpu.memory_space<vmem>>, %arg5: memref<1x32xf32, #tpu.memory_space<vmem>>, %arg6: memref<16x32xf32, #tpu.memory_space<vmem>>, %arg7: memref<16x32xf32, #tpu.memory_space<vmem>>) attributes {dimension_semantics = [#tpu.dimension_semantics<parallel>, #tpu.dimension_semantics<parallel>, #tpu.dimension_semantics<arbitrary>], iteration_bounds = array<i64: 1, 1, 1>, scalar_prefetch = 0 : i64, scratch_operands = 1 : i64, tpu.core_type = #tpu.core_type<tc>, window_params = [{transform_indices = @transform_0, window_bounds = array<i64: 16, 32>}, {transform_indices = @transform_1, window_bounds = array<i64: 32, 32>}, {transform_indices = @transform_2, window_bounds = array<i64: 1, 32>}, {transform_indices = @transform_3, window_bounds = array<i64: 16, 32>}]} {
    %c0_i32 = arith.constant 0 : i32
    %0 = arith.cmpi eq, %arg2, %c0_i32 : i32
    %1 = arith.extui %0 : i1 to i32
    %c0_i32_0 = arith.constant 0 : i32
    %2 = arith.cmpi ne, %1, %c0_i32_0 : i32
    scf.if %2 {
      %cst_10 = arith.constant 0.000000e+00 : f32
      %12 = vector.broadcast %cst_10 : f32 to vector<16x32xf32>
      %c0_11 = arith.constant 0 : index
      %c0_12 = arith.constant 0 : index
      %13 = vector.load %arg7[%c0_11, %c0_12] : memref<16x32xf32, #tpu.memory_space<vmem>>, vector<16x32xf32>
      tpu.vector_store %arg7[%c0_11, %c0_12], %12 {strides = array<i32>} : memref<16x32xf32, #tpu.memory_space<vmem>>, vector<16x32xf32>,
    } else {
    }
    %c0 = arith.constant 0 : index
    %c0_1 = arith.constant 0 : index
    %3 = vector.load %arg7[%c0, %c0_1] : memref<16x32xf32, #tpu.memory_space<vmem>>, vector<16x32xf32>
    %c0_2 = arith.constant 0 : index
    %c0_3 = arith.constant 0 : index
    %4 = vector.load %arg3[%c0_2, %c0_3] : memref<16x32xf32, #tpu.memory_space<vmem>>, vector<16x32xf32>
    %c0_4 = arith.constant 0 : index
    %c0_5 = arith.constant 0 : index
    %5 = vector.load %arg4[%c0_4, %c0_5] : memref<32x32xf32, #tpu.memory_space<vmem>>, vector<32x32xf32>
    %cst = arith.constant dense<0.000000e+00> : vector<16x32xf32>
    %6 = tpu.matmul %4, %5, %cst {dimension_numbers = #tpu.dot_dimension_numbers<[1], [0], [0], [1], [0, 0, 1, 1], [], []>} : vector<16x32xf32>, vector<32x32xf32>, vector<16x32xf32> -> vector<16x32xf32>
    %7 = arith.addf %3, %6 : vector<16x32xf32>
    %c0_6 = arith.constant 0 : index
    %c0_7 = arith.constant 0 : index
    %8 = vector.load %arg7[%c0_6, %c0_7] : memref<16x32xf32, #tpu.memory_space<vmem>>, vector<16x32xf32>
    tpu.vector_store %arg7[%c0_6, %c0_7], %7 {strides = array<i32>} : memref<16x32xf32, #tpu.memory_space<vmem>>, vector<16x32xf32>,
    %c0_i32_8 = arith.constant 0 : i32
    %9 = arith.cmpi eq, %arg2, %c0_i32_8 : i32
    %10 = arith.extui %9 : i1 to i32
    %c0_i32_9 = arith.constant 0 : i32
    %11 = arith.cmpi ne, %10, %c0_i32_9 : i32
    scf.if %11 {
      %c0_10 = arith.constant 0 : index
      %c0_11 = arith.constant 0 : index
      %12 = vector.load %arg7[%c0_10, %c0_11] : memref<16x32xf32, #tpu.memory_space<vmem>>, vector<16x32xf32>
      %c0_12 = arith.constant 0 : index
      %c0_13 = arith.constant 0 : index
      %13 = vector.load %arg5[%c0_12, %c0_13] : memref<1x32xf32, #tpu.memory_space<vmem>>, vector<1x32xf32>
      %14 = vector.broadcast %13 : vector<1x32xf32> to vector<16x32xf32>
      %15 = arith.addf %12, %14 : vector<16x32xf32>
      %c0_14 = arith.constant 0 : index
      %c0_15 = arith.constant 0 : index
      %16 = vector.load %arg6[%c0_14, %c0_15] : memref<16x32xf32, #tpu.memory_space<vmem>>, vector<16x32xf32>
      tpu.vector_store %arg6[%c0_14, %c0_15], %15 {strides = array<i32>} : memref<16x32xf32, #tpu.memory_space<vmem>>, vector<16x32xf32>,
    } else {
    }
    return
  }
  func.func @transform_0(%arg0: i32, %arg1: i32, %arg2: i32) -> (i32, i32) {
    %c0_i32 = arith.constant 0 : i32
    return %arg0, %arg2 : i32, i32
  }
  func.func @transform_1(%arg0: i32, %arg1: i32, %arg2: i32) -> (i32, i32) {
    %c0_i32 = arith.constant 0 : i32
    return %arg2, %arg1 : i32, i32
  }
  func.func @transform_2(%arg0: i32, %arg1: i32, %arg2: i32) -> (i32, i32) {
    %c0_i32 = arith.constant 0 : i32
    %c0_i32_0 = arith.constant 0 : i32
    return %c0_i32, %arg1 : i32, i32
  }
  func.func @transform_3(%arg0: i32, %arg1: i32, %arg2: i32) -> (i32, i32) {
    %c0_i32 = arith.constant 0 : i32
    return %arg0, %arg1 : i32, i32
  }
}

</mosaic_0001>

<bundles_post_ra>
// kernel: tpu_custom_call.1
= control target key start
LH: loop header
LB: loop body
LE: loop exit
PB: predicated region body
PF: predicated region fallthrough
CT: control target
= control target key end

     0   :  { %8 = vsyncpa [#allocation4], 0  ;;  %s366_s0 = inlined_call_operand.hbm [shape: f32[16,32], index: 0, kind: input, shape index: {}]   ;;  %s367_s1 = inlined_call_operand.hbm [shape: f32[32,32], index: 1, kind: input, shape index: {}]   ;;  %s368_s2 = inlined_call_operand.vmem [shape: f32[1,32], index: 2, kind: input, shape index: {}]   ;;  %s369_s3 = inlined_call_operand.hbm [shape: f32[16,32], index: 3, kind: output, shape index: {}]  }
   0x1   :  { %9 = vsyncpa [#allocation7], 0 }
   0x2   :  { %10 = vsyncpa [#allocation5], 0  ;;  %s284_s12 = smov [#allocation3]   ;;  %s212_s16 = scalar_lea.hbm %s366_s0, 256 }
   0x3   :  { %s16_s13 = sshll.u32 %s284_s12, 4  ;;  %p213_p0 = scmp.ne.s32.totalorder %s366_s0, %s212_s16  ;;  %s17_s13 = int_to_ptr.vmem [resolvable:$true] %s16_s13 }
   0x4   :  { %p216_p1 = scmp.lt.u32.totalorder %s212_s16, %s366_s0 }
   0x6   :  { %p218_p2 = pnand %p216_p1, %p213_p0 }
   0x8   :  { %221 = shalt.err (!%p218_p2)
}
   0x9   :  { %s222_s21 = scalar_lea.vmem %s17_s13, 256  ;;  %p227_p4 = scmp.lt.s32.totalorder %s17_s13, %s17_s13 }
   0xa   :  { %p223_p3 = scmp.ne.s32.totalorder %s17_s13, %s222_s21  ;;  %p228_p5 = scmp.lt.s32.totalorder %s222_s21, %s222_s21 }
   0xc   :  { %p229_p6 = por %p228_p5, %p227_p4 }
   0xe   :  { %p230_p7 = pnand %p229_p6, %p223_p3 }
  0x10   :  { %233 = shalt.err (!%p230_p7)
}
  0x11   :  { %s285_s22 = smov 128   ;;  %s286_s23 = smov 8  }
  0x12   :  { %22 = dma.hbm_to_vmem [thread:$0]  %s366_s0, 256, %s17_s13, [#allocation4], %s285_s22, %s285_s22, %s286_s23  }
  0x13   :  { %s287_s26 = smov [#allocation6]   ;;  %s234_s30 = scalar_lea.hbm %s367_s1, 512 }
  0x14   :  { %s28_s27 = sshll.u32 %s287_s26, 4  ;;  %p235_p8 = scmp.ne.s32.totalorder %s367_s1, %s234_s30  ;;  %s29_s27 = int_to_ptr.vmem [resolvable:$true] %s28_s27 }
  0x15   :  { %p238_p9 = scmp.lt.u32.totalorder %s234_s30, %s367_s1 }
  0x17   :  { %p240_p10 = pnand %p238_p9, %p235_p8 }
  0x19   :  { %243 = shalt.err (!%p240_p10)
}
  0x1a   :  { %s244_s8 = scalar_lea.vmem %s29_s27, 512  ;;  %p249_p12 = scmp.lt.s32.totalorder %s29_s27, %s29_s27 }
  0x1b   :  { %p245_p11 = scmp.ne.s32.totalorder %s29_s27, %s244_s8  ;;  %p250_p13 = scmp.lt.s32.totalorder %s244_s8, %s244_s8 }
  0x1d   :  { %p251_p0 = por %p250_p13, %p249_p12 }
  0x1f   :  { %p252_p1 = pnand %p251_p0, %p245_p11 }
  0x21   :  { %255 = shalt.err (!%p252_p1)
}
  0x22   :  { %34 = dma.hbm_to_vmem [thread:$0]  %s367_s1, 512, %s29_s27, [#allocation7], %s285_s22, %s285_s22, %s286_s23  }
  0x23   :  { %278 = dma.done.wait [#allocation4], 256  }
  0x24   :  { %279 = vsyncadd [#allocation4], 4294967040 }
  0x25   :  { %280 = dma.done.wait [#allocation7], 512  }
  0x26   :  { %281 = vsyncadd [#allocation7], 4294966784  ;;  %vm47_vm0 = vcmask 261120   ;;  %v288_v0 = vmov 0.0   ;;  %v54_v1 = vld [vmem:[#allocation6] sm:$0xff]  ;;  %v55_v2 = vld [vmem:[#allocation6 + $0x8] sm:$0xff] }
  0x27   :  { %49 = vst.msk [vmem:[#allocation2 + $0x8] sm:$0xff] %vm47_vm0, %v288_v0  ;;  %48 = vst.msk [vmem:[#allocation2] sm:$0xff] %vm47_vm0, %v288_v0  ;;  %v56_v3 = vld [vmem:[#allocation6 + $0x10] sm:$0xff]  ;;  %v198_v4 = vpack.c.bf16 %v55_v2, %v54_v1  ;;  %v57_v5 = vld [vmem:[#allocation6 + $0x18] sm:$0xff]  ;;  %s289_s11 = smov [#allocation8]  }
  0x28   :  { %v52_v6 = vld [vmem:[#allocation3] sm:$0xff]  ;;  %v202_v7 = vpack.c.bf16 %v57_v5, %v56_v3  ;;  %v53_v8 = vld [vmem:[#allocation3 + $0x8] sm:$0xff]  ;;  %v180_v15 = vld [vmem:[%s368_s2] ss:$0 sm:$0xff]  ;;  %s165_s12 = sshll.u32 %s289_s11, 4  ;;  %s166_s12 = int_to_ptr.vmem [resolvable:$true] %s165_s12 }
  0x29   :  { %195 = vmatprep.mubr.msk.f32.mxu0 %vm47_vm0, %v52_v6  ;;  %199 = vmatprep.subr.bf16.mxu0 %v198_v4  ;;  %s256_s13 = scalar_lea.vmem %s166_s12, 256  ;;  %p261_p3 = scmp.lt.s32.totalorder %s166_s12, %s166_s12 }
  0x2a   :  { %201 = vmatpush3.bf16.msra.mxu0 %v198_v4  ;;  %p257_p2 = scmp.ne.s32.totalorder %s166_s12, %s256_s13  ;;  %p262_p4 = scmp.lt.s32.totalorder %s256_s13, %s256_s13 }
  0x2b   :  { %203 = vmatprep.subr.bf16.mxu0 %v202_v7 }
  0x2c   :  { %p263_p5 = por %p262_p4, %p261_p3 }
  0x2e   :  { %205 = vmatpush3.bf16.msra.mxu0 %v202_v7  ;;  %v51_v9 = vld [vmem:[#allocation2 + $0x8] sm:$0xff]  ;;  %v50_v10 = vld [vmem:[#allocation2] sm:$0xff]  ;;  %p264_p6 = pnand %p263_p5, %p257_p2 }
  0x31   :  { %196 = vmatmul.mubr.msk.f32.vlgmr.msra.gmra.mrb[0].mxu0 %vm47_vm0, %v53_v8 }
 0x104   :  { %v197_v11 = vpop.f32.mrb[0].mxu0 }
 0x105   :  { %v141_v12 = vadd.f32 %v197_v11, %v51_v9  ;;  %v131_v13 = vpop.f32.mrb[1].mxu0 }
 0x106   :  { %v140_v14 = vadd.f32 %v131_v13, %v50_v10 }
 0x107   :  { %143 = vst.msk [vmem:[#allocation2 + $0x8] sm:$0xff] %vm47_vm0, %v141_v12 }
 0x108   :  { %142 = vst.msk [vmem:[#allocation2] sm:$0xff] %vm47_vm0, %v140_v14 }
 0x10e   :  { %v148_v16 = vld [vmem:[#allocation2 + $0x8] sm:$0xff] }
 0x10f   :  { %v147_v17 = vld [vmem:[#allocation2] sm:$0xff]  ;;  %v157_v18 = vadd.f32 %v180_v15, %v148_v16 }
 0x110   :  { %v156_v19 = vadd.f32 %v180_v15, %v147_v17 }
 0x111   :  { %159 = vst.msk [vmem:[#allocation8 + $0x8] sm:$0xff] %vm47_vm0, %v157_v18 }
 0x112   :  { %158 = vst.msk [vmem:[#allocation8] sm:$0xff] %vm47_vm0, %v156_v19 }
 0x113   :  { %267 = shalt.err (!%p264_p6)
}
 0x114   :  { %s268_s15 = scalar_lea.hbm %s369_s3, 256 }
 0x115   :  { %p269_p7 = scmp.ne.s32.totalorder %s369_s3, %s268_s15  ;;  %p272_p8 = scmp.lt.u32.totalorder %s268_s15, %s369_s3 }
 0x117   :  { %p274_p9 = pnand %p272_p8, %p269_p7 }
 0x119   :  { %277 = shalt.err (!%p274_p9)
}
 0x11a   :  { %171 = dma.vmem_to_hbm [thread:$0]  %s166_s12, 256, %s369_s3, [#allocation5], %s285_s22, %s285_s22, %s286_s23  }
 0x11b   :  { %282 = dma.done.wait [#allocation5], 256  }
 0x11c   :  { %283 = vsyncadd [#allocation5], 4294967040 }
 0x11d   :  { %175 = vsyncpa [#allocation4], 1 }
 0x11e   :  { %176 = vsyncpa [#allocation7], 1 }
 0x11f   :  { %177 = vsyncpa [#allocation5], 1 }

</bundles_post_ra>
